<compile_context>
chip_gen: v5e
topology: v5e:2x2
jax: 0.10.0
libtpu: 0.0.40
codegen_flags: <defaults>
</compile_context>

<pallas_src>
import functools

import jax
import jax.numpy as jnp
from jax.experimental import pallas as pl
from jax.experimental.pallas import tpu as pltpu


def _round_up(x, m):
    return (x + m - 1) // m * m


def _default_epilogue_dtype():
    """bf16 epilogue on chips with bf16 VPU/EUP (v6e/v7x); f32 otherwise."""
    try:
        kind = jax.devices()[0].device_kind.lower()
    except Exception:
        return jnp.float32
    if ("v6" in kind) or ("v7" in kind) or ("7x" in kind):
        return jnp.bfloat16
    return jnp.float32


# ----------------------------------------------------------------------------- kernel

def _gated_attention_kernel(xT_ref, w_ref, b_ref, ww_ref, o_ref, s_ref, *,
                            n_valid, h, epi_dtype):
    # xT_ref : (Bt, F_pad, N_pad) bf16   -- Bt batch elements, transposed (lane = instance)
    # w_ref  : (2H, F_pad)        bf16   -- [Wv^T ; Wu^T] stacked
    # b_ref  : (2H, 1)            f32    -- [bv ; bu]
    # ww_ref : (H, 1)             f32    -- final Linear(h, 1) weight (column)
    # o_ref  : (1, Bt, N_pad)     f32    -- one dense (Bt, N_pad) slab per grid step
    # s_ref  : (Bt, N_pad)        f32    -- VMEM scratch for the stacked scores
    bt = xT_ref.shape[0]
    w = w_ref[...]                                   # (2H, F_pad) bf16
    bias = b_ref[...]                                # (2H, 1)     f32
    ww = ww_ref[...].astype(epi_dtype)               # (H, 1)

    for b in range(bt):                              # unrolled (bt <= 8)
        # one stacked MXU matmul per batch element: f32 accumulation
        pre = jnp.dot(w, xT_ref[b], preferred_element_type=jnp.float32) + bias
        pre = pre.astype(epi_dtype)                  # (2H, N_pad)
        g = jnp.tanh(pre[:h, :]) * jax.nn.sigmoid(pre[h:, :])     # (H, N_pad)
        # per-instance score = sum_h g[h, n] * ww[h]
        row = jnp.sum(g * ww, axis=0, keepdims=True).astype(jnp.float32)  # (1, N_pad)
        s_ref[pl.ds(b, 1), :] = row

    # mask padded instance lanes, softmax over the lane (instance) axis, f32
    scores = s_ref[...]                                            # (Bt, N_pad)
    lane = jax.lax.broadcasted_iota(jnp.int32, scores.shape, 1)
    scores = jnp.where(lane < n_valid, scores, -jnp.inf)
    m = jnp.max(scores, axis=-1, keepdims=True)
    e = jnp.exp(scores - m)
    denom = jnp.sum(e, axis=-1, keepdims=True)
    o_ref[0] = e * pl.reciprocal(denom, approx=True)               # (Bt, N_pad)


# ----------------------------------------------------------------------------- wrapper

def gated_attention(x, params, *, bt_max=8, epilogue_dtype=None):
    """x: (B, N, f_in) f32 -> attention weights (B, 1, N), softmax over N."""
    B, N, F = x.shape
    H = params["wv"].shape[1]                       # hidden = 128 (lane-aligned)
    F_pad = _round_up(F, 128)
    N_pad = _round_up(N, 128)

    if epilogue_dtype is None:
        epilogue_dtype = _default_epilogue_dtype()

    # batch tile: as large as possible, but keep >=2 grid steps when B >= 2
    # so both v7x TensorCores get work.
    bt = max(1, min(bt_max, B))
    while bt > 1 and -(-B // bt) < 2:
        bt = (bt + 1) // 2
    B_pad = _round_up(B, bt)
    steps = B_pad // bt

    # lane-dense layout: per-batch x^T; zero-pad B, F (contraction) and N (lane).
    xT = jnp.transpose(x, (0, 2, 1)).astype(jnp.bfloat16)          # (B, F, N)
    xT = jnp.pad(xT, ((0, B_pad - B), (0, F_pad - F), (0, N_pad - N)))

    # stacked weights / biases; bw dropped (softmax shift invariance).
    w_stacked = jnp.concatenate([params["wv"].T, params["wu"].T], axis=0)       # (2H, F)
    w_stacked = jnp.pad(w_stacked, ((0, 0), (0, F_pad - F))).astype(jnp.bfloat16)
    b_stacked = jnp.concatenate([params["bv"], params["bu"]]).reshape(2 * H, 1)
    b_stacked = b_stacked.astype(jnp.float32)
    ww = params["ww"].reshape(H, 1).astype(jnp.float32)

    kernel = functools.partial(_gated_attention_kernel,
                               n_valid=N, h=H, epi_dtype=epilogue_dtype)
    out = pl.pallas_call(
        kernel,
        out_shape=jax.ShapeDtypeStruct((steps, bt, N_pad), jnp.float32),
        grid=(steps,),
        in_specs=[
            pl.BlockSpec((bt, F_pad, N_pad), lambda i: (i, 0, 0)),   # x^T (per tile)
            pl.BlockSpec((2 * H, F_pad), lambda i: (0, 0)),          # [Wv^T;Wu^T] resident
            pl.BlockSpec((2 * H, 1), lambda i: (0, 0)),              # [bv;bu]
            pl.BlockSpec((H, 1), lambda i: (0, 0)),                  # ww
        ],
        out_specs=pl.BlockSpec((1, bt, N_pad), lambda i: (i, 0, 0)),
        scratch_shapes=[pltpu.VMEM((bt, N_pad), jnp.float32)],
        compiler_params=pltpu.CompilerParams(
            dimension_semantics=("parallel",),
            vmem_limit_bytes=64 * 1024 * 1024),
    )(xT, w_stacked, b_stacked, ww)

    out = out.reshape(B_pad, N_pad)[:B, :N]
    return out[:, None, :]                                           # (B, 1, N)


# ----------------------------------------------------------------------------- params / reference

def make_params(key, f_in, h=128):
    """Deterministic init matching nn.Linear defaults: U(-1/sqrt(fan_in), 1/sqrt(fan_in))."""
    ks = jax.random.split(key, 6)
    lim_in = 1.0 / (f_in ** 0.5)
    lim_h = 1.0 / (h ** 0.5)
    return {
        "wv": jax.random.uniform(ks[0], (f_in, h), jnp.float32, -lim_in, lim_in),
        "bv": jax.random.uniform(ks[1], (h,), jnp.float32, -lim_in, lim_in),
        "wu": jax.random.uniform(ks[2], (f_in, h), jnp.float32, -lim_in, lim_in),
        "bu": jax.random.uniform(ks[3], (h,), jnp.float32, -lim_in, lim_in),
        "ww": jax.random.uniform(ks[4], (h,), jnp.float32, -lim_h, lim_h),
        "bw": jax.random.uniform(ks[5], (), jnp.float32, -lim_h, lim_h),
    }


def reference(x, p):
    v = jnp.tanh(x @ p["wv"] + p["bv"])
    u = jax.nn.sigmoid(x @ p["wu"] + p["bu"])
    a = (v * u) @ p["ww"].reshape(-1, 1) + p["bw"]   # (B, N, 1)
    a = jnp.transpose(a, (0, 2, 1))                  # (B, 1, N)
    return jax.nn.softmax(a, axis=2)


# ----------------------------------------------------------------------------- main

if __name__ == "__main__":
    key = jax.random.PRNGKey(0)
    k_param, k_x = jax.random.split(key)

    batch, n_inst, f_in = 2, 64, 256                 # (B, num_instances, f_in); hidden h = 128
    params = make_params(k_param, f_in)
    x = jax.random.normal(k_x, (batch, n_inst, f_in), jnp.float32)

    fwd = jax.jit(gated_attention)
    out = jax.block_until_ready(fwd(x, params))

    ref = reference(x, params)
    assert out.shape == (batch, 1, n_inst), out.shape
    assert bool(jnp.all(jnp.isfinite(out)))
    assert bool(jnp.allclose(jnp.sum(out, axis=-1), 1.0, atol=5e-3))
    assert bool(jnp.allclose(out, ref, atol=1e-2))
    print("KERNEL_OK")
</pallas_src>

<mosaic_0001>
module attributes {stable_mosaic.version = 11 : i64} {
  func.func @_gated_attention_kernel(%arg0: i32, %arg1: memref<1x256x128xbf16, #tpu.memory_space<vmem>>, %arg2: memref<256x256xbf16, #tpu.memory_space<vmem>>, %arg3: memref<256x1xf32, #tpu.memory_space<vmem>>, %arg4: memref<128x1xf32, #tpu.memory_space<vmem>>, %arg5: memref<1x1x128xf32, #tpu.memory_space<vmem>>, %arg6: memref<1x128xf32, #tpu.memory_space<vmem>>) attributes {dimension_semantics = [#tpu.dimension_semantics<parallel>], iteration_bounds = array<i64: 2>, scalar_prefetch = 0 : i64, scratch_operands = 1 : i64, tpu.core_type = #tpu.core_type<tc>, window_params = [{transform_indices = @transform_0, window_bounds = array<i64: 1, 256, 128>}, {pipeline_mode = #tpu.pipeline_mode<synchronous>, transform_indices = @transform_1, window_bounds = array<i64: 256, 256>}, {pipeline_mode = #tpu.pipeline_mode<synchronous>, transform_indices = @transform_2, window_bounds = array<i64: 256, 1>}, {pipeline_mode = #tpu.pipeline_mode<synchronous>, transform_indices = @transform_3, window_bounds = array<i64: 128, 1>}, {transform_indices = @transform_4, window_bounds = array<i64: 1, 1, 128>}]} {
    %c0 = arith.constant 0 : index
    %c0_0 = arith.constant 0 : index
    %0 = vector.load %arg2[%c0, %c0_0] : memref<256x256xbf16, #tpu.memory_space<vmem>>, vector<256x256xbf16>
    %c0_1 = arith.constant 0 : index
    %c0_2 = arith.constant 0 : index
    %1 = vector.load %arg3[%c0_1, %c0_2] : memref<256x1xf32, #tpu.memory_space<vmem>>, vector<256x1xf32>
    %c0_3 = arith.constant 0 : index
    %c0_4 = arith.constant 0 : index
    %2 = vector.load %arg4[%c0_3, %c0_4] : memref<128x1xf32, #tpu.memory_space<vmem>>, vector<128x1xf32>
    %c0_5 = arith.constant 0 : index
    %c0_6 = arith.constant 0 : index
    %c0_7 = arith.constant 0 : index
    %3 = vector.load %arg1[%c0_5, %c0_6, %c0_7] : memref<1x256x128xbf16, #tpu.memory_space<vmem>>, vector<1x256x128xbf16>
    %4 = vector.shape_cast %3 : vector<1x256x128xbf16> to vector<256x128xbf16>
    %cst = arith.constant dense<0.000000e+00> : vector<256x128xf32>
    %5 = tpu.matmul %0, %4, %cst {dimension_numbers = #tpu.dot_dimension_numbers<[1], [0], [0], [1], [0, 0, 1, 1], [], []>} : vector<256x256xbf16>, vector<256x128xbf16>, vector<256x128xf32> -> vector<256x128xf32>
    %6 = vector.broadcast %1 : vector<256x1xf32> to vector<256x128xf32>
    %7 = arith.addf %5, %6 : vector<256x128xf32>
    %8 = vector.extract_strided_slice %7 {offsets = [0, 0], sizes = [128, 128], strides = [1, 1]} : vector<256x128xf32> to vector<128x128xf32>
    %9 = math.tanh %8 : vector<128x128xf32>
    %10 = vector.extract_strided_slice %7 {offsets = [128, 0], sizes = [128, 128], strides = [1, 1]} : vector<256x128xf32> to vector<128x128xf32>
    %11 = arith.negf %10 : vector<128x128xf32>
    %12 = math.exp %11 : vector<128x128xf32>
    %cst_8 = arith.constant 1.000000e+00 : f32
    %13 = vector.broadcast %cst_8 : f32 to vector<128x128xf32>
    %14 = arith.addf %13, %12 : vector<128x128xf32>
    %15 = arith.divf %13, %14 : vector<128x128xf32>
    %16 = arith.mulf %9, %15 : vector<128x128xf32>
    %17 = vector.broadcast %2 : vector<128x1xf32> to vector<128x128xf32>
    %18 = arith.mulf %16, %17 : vector<128x128xf32>
    %cst_9 = arith.constant dense<0.000000e+00> : vector<128xf32>
    %19 = vector.multi_reduction <add>, %18, %cst_9 [0] : vector<128x128xf32> to vector<128xf32>
    %20 = vector.shape_cast %19 : vector<128xf32> to vector<1x128xf32>
    %c0_10 = arith.constant 0 : index
    %c0_11 = arith.constant 0 : index
    %21 = vector.load %arg6[%c0_10, %c0_11] : memref<1x128xf32, #tpu.memory_space<vmem>>, vector<1x128xf32>
    tpu.vector_store %arg6[%c0_10, %c0_11], %20 {strides = array<i32>} : memref<1x128xf32, #tpu.memory_space<vmem>>, vector<1x128xf32>,
    %c0_12 = arith.constant 0 : index
    %c0_13 = arith.constant 0 : index
    %22 = vector.load %arg6[%c0_12, %c0_13] : memref<1x128xf32, #tpu.memory_space<vmem>>, vector<1x128xf32>
    %23 = tpu.iota {dimensions = array<i32: 1>} : vector<1x128xi32>
    %c64_i32 = arith.constant 64 : i32
    %24 = vector.broadcast %c64_i32 : i32 to vector<1x128xi32>
    %25 = arith.cmpi slt, %23, %24 : vector<1x128xi32>
    %cst_14 = arith.constant 0xFF800000 : f32
    %26 = vector.broadcast %cst_14 : f32 to vector<1x128xf32>
    %27 = arith.select %25, %22, %26 : vector<1x128xi1>, vector<1x128xf32>
    %cst_15 = arith.constant dense<0xFF800000> : vector<1xf32>
    %28 = vector.multi_reduction <maximumf>, %27, %cst_15 [1] : vector<1x128xf32> to vector<1xf32>
    %29 = vector.shape_cast %28 : vector<1xf32> to vector<1x1xf32>
    %30 = vector.broadcast %29 : vector<1x1xf32> to vector<1x128xf32>
    %31 = arith.subf %27, %30 : vector<1x128xf32>
    %32 = math.exp %31 : vector<1x128xf32>
    %cst_16 = arith.constant dense<0.000000e+00> : vector<1xf32>
    %33 = vector.multi_reduction <add>, %32, %cst_16 [1] : vector<1x128xf32> to vector<1xf32>
    %34 = vector.shape_cast %33 : vector<1xf32> to vector<1x1xf32>
    %35 = tpu.reciprocal %34 {approx = true} : vector<1x1xf32> -> vector<1x1xf32>
    %36 = vector.broadcast %35 : vector<1x1xf32> to vector<1x128xf32>
    %37 = arith.mulf %32, %36 : vector<1x128xf32>
    %c0_17 = arith.constant 0 : index
    %c0_18 = arith.constant 0 : index
    %c0_19 = arith.constant 0 : index
    %38 = vector.load %arg5[%c0_17, %c0_18, %c0_19] : memref<1x1x128xf32, #tpu.memory_space<vmem>>, vector<1x1x128xf32>
    %39 = vector.shape_cast %38 : vector<1x1x128xf32> to vector<1x128xf32>
    %40 = vector.shape_cast %37 : vector<1x128xf32> to vector<1x1x128xf32>
    tpu.vector_store %arg5[%c0_17, %c0_18, %c0_19], %40 {strides = array<i32>} : memref<1x1x128xf32, #tpu.memory_space<vmem>>, vector<1x1x128xf32>,
    return
  }
  func.func @transform_0(%arg0: i32) -> (i32, i32, i32) {
    %c0_i32 = arith.constant 0 : i32
    %c0_i32_0 = arith.constant 0 : i32
    %c0_i32_1 = arith.constant 0 : i32
    return %arg0, %c0_i32, %c0_i32_0 : i32, i32, i32
  }
  func.func @transform_1(%arg0: i32) -> (i32, i32) {
    %c0_i32 = arith.constant 0 : i32
    %c0_i32_0 = arith.constant 0 : i32
    %c0_i32_1 = arith.constant 0 : i32
    return %c0_i32, %c0_i32_0 : i32, i32
  }
  func.func @transform_2(%arg0: i32) -> (i32, i32) {
    %c0_i32 = arith.constant 0 : i32
    %c0_i32_0 = arith.constant 0 : i32
    %c0_i32_1 = arith.constant 0 : i32
    return %c0_i32, %c0_i32_0 : i32, i32
  }
  func.func @transform_3(%arg0: i32) -> (i32, i32) {
    %c0_i32 = arith.constant 0 : i32
    %c0_i32_0 = arith.constant 0 : i32
    %c0_i32_1 = arith.constant 0 : i32
    return %c0_i32, %c0_i32_0 : i32, i32
  }
  func.func @transform_4(%arg0: i32) -> (i32, i32, i32) {
    %c0_i32 = arith.constant 0 : i32
    %c0_i32_0 = arith.constant 0 : i32
    %c0_i32_1 = arith.constant 0 : i32
    return %arg0, %c0_i32, %c0_i32_0 : i32, i32, i32
  }
}

</mosaic_0001>

<bundles_post_ra>
// kernel: gated_attention.1
= control target key start
LH: loop header
LB: loop body
LE: loop exit
PB: predicated region body
PF: predicated region fallthrough
CT: control target
= control target key end

     0   :  { %9 = vsyncpa [#allocation4], 0  ;;  %s2760_s0 = inlined_call_operand.vmem [shape: bf16[2,256,128], index: 0, kind: input, shape index: {}]   ;;  %s2761_s1 = inlined_call_operand.vmem [shape: bf16[256,256], index: 1, kind: input, shape index: {}]   ;;  %s2762_s2 = inlined_call_operand.vmem [shape: f32[256,1], index: 2, kind: input, shape index: {}]   ;;  %s2763_s3 = inlined_call_operand.vmem [shape: f32[128,1], index: 3, kind: input, shape index: {}]   ;;  %s2764_s4 = inlined_call_operand.hbm [shape: f32[2,1,128], index: 4, kind: output, shape index: {}]  }
   0x1   :  { %11 = vsyncpa [#allocation4 + $0x1], 0  ;;  %s1955_s15 = smov 0   ;;  %s1957_s16 = smov 0  }
   0x2   :  { %s1959_s17 = smov 0   ;;  %s1961_s18 = smov 0  }
   0x3 LB: > { %s1976_s19 = sadd.s32 4294967295, %s1927_s18   ;;  %s1441_s20 = sadd.s32 4294967294, %s1927_s18   ;;  %s1927_s18 = sphi %s1961_s18, %s2792_s18   ;;  %s1923_s17 = sphi %s1959_s17, %s2791_s17   ;;  %s1919_s16 = sphi %s1957_s16, %s2790_s16   ;;  %s1915_s15 = sphi %s1955_s15, %s2789_s15  }
   0x4   : > { %s1980_s21 = sadd.s32 1, %s1927_s18   ;;  %s113_s22 = sadd.s32 1, %s1923_s17 }
   0x5   : > { %s110_s23 = ssub.s32 %s1927_s18, %s1980_s21  ;;  %p123_p0 = scmp.ne.s32.totalorder %s1923_s17, %s1919_s16 }
   0x6   : > { %p111_p1 = scmp.eq.s32.totalorder %s110_s23, 0  ;;  %p124_p2 = scmp.eq.s32.totalorder %s1976_s19, 1 }
   0x7   : > { %p129_p3 = scmp.ne.s32.totalorder %s1919_s16, %s1915_s15  ;;  %p130_p4 = scmp.eq.s32.totalorder %s1441_s20, 1 }
   0x8   : > { %s1991_s24 = scalar_select %p111_p1, %s1923_s17, %s113_s22  }
   0x9   : > { %p1993_p5 = por %p124_p2, %p123_p0  ;;  %p1997_p6 = por %p130_p4, %p129_p3 }
   0xa   : > { %p1444_p7 = scmp.ge.s32.totalorder %s1927_s18, 1  ;;  %p165_p8 = scmp.lt.s32.totalorder %s1927_s18, 3 }
   0xc   : > { %p166_p9 = pnand %p1444_p7, %p165_p8 }
   0xd   : > { %p190_p10 = scmp.lt.s32.totalorder (!%p166_p9), %s1976_s19, 1  ;;  %s188_s10 = sand.u32 (!%p166_p9), 1, %s1919_s16  }
   0xe   : > { %169 = sbr.rel (%p166_p9) target bundleno = 624 (0x270), region = 36  ;;  %s1382_s14 = scalar_lea.hbm (!%p166_p9), %s2764_s4, %s1976_s19 }
   0xf   : > { %s189_s20 = scalar_lea.vmem (!%p166_p9), [#allocation3], %s188_s10  ;;  %s1386_s23 = sshll.u32 (!%p166_p9), %s1382_s14, 4  ;;  %s1387_s23 = int_to_ptr.hbm [resolvable:$true] %s1386_s23 }
  0x10   : > { %s1384_s22 = sshll.u32 (!%p166_p9), %s189_s20, 4  ;;  %s1374_s27 = scalar_lea.sflag (!%p166_p9), [#allocation4], %s188_s10  ;;  %s1385_s22 = int_to_ptr.vmem [resolvable:$true] %s1384_s22 }
  0x13   : > { %v231_v0 = vld [vmem:[%s2762_s2 + $0x20] sm:$0xff]  ;;  %v229_v1 = vld [vmem:[%s2762_s2 + $0x10] sm:$0xff]  ;;  %v1929_v3 = vmov 0   ;;  %s191_s7 = scalar_select %p190_p10, %s1976_s19, 1  ;;  %v232_v6 = vld [vmem:[%s2762_s2 + $0x28] sm:$0xff] }
  0x14   : > { %v227_v2 = vld [vmem:[%s2762_s2] sm:$0xff]  ;;  %1764 = vset.pattern.permute.xlu2 %v1929_v3  ;;  %1763 = vset.pattern.permute.xlu1 %v1929_v3  ;;  %v230_v7 = vld [vmem:[%s2762_s2 + $0x18] sm:$0xff]  ;;  %v228_v8 = vld [vmem:[%s2762_s2 + $0x8] sm:$0xff]  ;;  %s1885_s19 = scalar_lea.hbm %s2764_s4, 2 }
  0x15   : > { %1762 = vset.pattern.permute.xlu0 %v1929_v3  ;;  %329 = vperm.xlu2 %1764, %v231_v0   ;;  %s1657_s8 = sshll.u32 %s191_s7, 7  ;;  %v235_v13 = vld [vmem:[%s2762_s2 + $0x40] sm:$0xff]  ;;  %v234_v14 = vld [vmem:[%s2762_s2 + $0x38] sm:$0xff]  ;;  %v233_v15 = vld [vmem:[%s2762_s2 + $0x30] sm:$0xff] }
  0x16   : > { %319 = vperm.xlu1 %1763, %v229_v1   ;;  %309 = vperm.xlu0 %1762, %v227_v2   ;;  %s2017_s11 = scalar_lea.vmem %s2760_s0, %s1657_s8  ;;  %v238_v20 = vld [vmem:[%s2762_s2 + $0x58] sm:$0xff]  ;;  %v237_v21 = vld [vmem:[%s2762_s2 + $0x50] sm:$0xff]  ;;  %v236_v22 = vld [vmem:[%s2762_s2 + $0x48] sm:$0xff] }
  0x17   : > { %v1697_v4 = vld [vmem:[%s2017_s11 + $0x38] sm:$0xff]  ;;  %v1696_v9 = vld [vmem:[%s2017_s11 + $0x30] sm:$0xff]  ;;  %v1695_v11 = vld [vmem:[%s2017_s11 + $0x28] sm:$0xff] }
  0x18   : > { %v1705_v5 = vld [vmem:[%s2017_s11 + $0x78] sm:$0xff]  ;;  %723 = vmatpush.bf16.msra.mxu0 %v1697_v4  ;;  %1706 = vmatpush.bf16.msra.mxu2 %v1697_v4  ;;  %v1704_v10 = vld [vmem:[%s2017_s11 + $0x70] sm:$0xff]  ;;  %v1703_v12 = vld [vmem:[%s2017_s11 + $0x68] sm:$0xff] }
  0x19   : > { %1714 = vmatpush.bf16.msra.mxu3 %v1705_v5  ;;  %812 = vmatpush.bf16.msra.mxu1 %v1705_v5  ;;  %v1694_v16 = vld [vmem:[%s2017_s11 + $0x20] sm:$0xff]  ;;  %v1693_v18 = vld [vmem:[%s2017_s11 + $0x18] sm:$0xff]  ;;  %v1692_v23 = vld [vmem:[%s2017_s11 + $0x10] sm:$0xff] }
  0x1a   : > { %v1702_v17 = vld [vmem:[%s2017_s11 + $0x60] sm:$0xff]  ;;  %v1701_v19 = vld [vmem:[%s2017_s11 + $0x58] sm:$0xff]  ;;  %v1700_v24 = vld [vmem:[%s2017_s11 + $0x50] sm:$0xff] }
  0x1b   : > { %v1691_v25 = vld [vmem:[%s2017_s11 + $0x8] sm:$0xff]  ;;  %v243_v28 = vld [vmem:[%s2762_s2 + $0x80] sm:$0xff]  ;;  %v246_v45 = vld [vmem:[%s2762_s2 + $0x98] sm:$0xff] }
  0x1c   : > { %724 = vmatpush.bf16.msra.mxu0 %v1696_v9  ;;  %1707 = vmatpush.bf16.msra.mxu2 %v1696_v9  ;;  %v1699_v26 = vld [vmem:[%s2017_s11 + $0x48] sm:$0xff]  ;;  %v239_v29 = vld [vmem:[%s2762_s2 + $0x60] sm:$0xff]  ;;  %v245_v46 = vld [vmem:[%s2762_s2 + $0x90] sm:$0xff] }
  0x1d   : > { %334 = vperm.xlu2 %1764, %v232_v6   ;;  %1715 = vmatpush.bf16.msra.mxu3 %v1704_v10  ;;  %v244_v27 = vld [vmem:[%s2762_s2 + $0x88] sm:$0xff]  ;;  %v1449_v30 = vld [vmem:[%s2761_s1] sm:$0xf]  ;;  %v1674_v36 = vld [vmem:[%s2761_s1 + $0x84] sm:$0xf] }
  0x1e   : > { %324 = vperm.xlu1 %1763, %v230_v7   ;;  %314 = vperm.xlu0 %1762, %v228_v8   ;;  %v1690_v31 = vld [vmem:[%s2017_s11] sm:$0xff]  ;;  %v1659_v32 = vld [vmem:[%s2761_s1 + $0x4] sm:$0xf0]  ;;  %v1515_v37 = vld [vmem:[%s2761_s1 + $0x88] sm:$0xf0] }
  0x1f   : > { %813 = vmatpush.bf16.msra.mxu1 %v1704_v10  ;;  %v1513_v33 = vld [vmem:[%s2761_s1 + $0x80] sm:$0xf]  ;;  %v1675_v35 = vld [vmem:[%s2761_s1 + $0x84] sm:$0xf0]  ;;  %v1658_v38 = vld [vmem:[%s2761_s1 + $0x4] sm:$0xf]  ;;  %v1450_v40 = vor.u32 %v1659_v32, %v1449_v30  ;;  %v1518_v42 = vor.u32 %v1674_v36, %v1515_v37 }
  0x20   : > { %725 = vmatpush.bf16.msra.mxu0 %v1695_v11  ;;  %1708 = vmatpush.bf16.msra.mxu2 %v1695_v11  ;;  %v1698_v34 = vld [vmem:[%s2017_s11 + $0x40] sm:$0xff]  ;;  %v1451_v39 = vld [vmem:[%s2761_s1 + $0x8] sm:$0xf0]  ;;  %v1514_v41 = vor.u32 %v1675_v35, %v1513_v33  ;;  %v250_v47 = vld [vmem:[%s2762_s2 + $0xb8] sm:$0xff]  ;;  %s1879_s11 = sshra.s32 %s1387_s23, 4  ;;  %s1880_s11 = int_to_ptr.hbm [resolvable:$true] %s1879_s11 }
  0x21   : > { %1716 = vmatpush.bf16.msra.mxu3 %v1703_v12  ;;  %v1454_v43 = vor.u32 %v1658_v38, %v1451_v39  ;;  %v247_v44 = vld [vmem:[%s2762_s2 + $0xa0] sm:$0xff]  ;;  %v249_v48 = vld [vmem:[%s2762_s2 + $0xb0] sm:$0xff]  ;;  %v248_v49 = vld [vmem:[%s2762_s2 + $0xa8] sm:$0xff]  ;;  %s1881_s28 = scalar_lea.hbm %s1880_s11, 1  ;;  %p1886_p0 = scmp.lt.s32.totalorder %s1880_s11, %s2764_s4 }
  0x22   : > { %v1457_v50 = vld [vmem:[%s2761_s1 + $0x10] sm:$0xf]  ;;  %v1661_v51 = vld [vmem:[%s2761_s1 + $0x14] sm:$0xf0]  ;;  %v1676_v54 = vld [vmem:[%s2761_s1 + $0x94] sm:$0xf]  ;;  %p1882_p11 = scmp.ne.s32.totalorder %s1880_s11, %s1881_s28  ;;  %p1887_p1 = scmp.lt.s32.totalorder %s1885_s19, %s1881_s28 }
  0x23   : > { %814 = vmatpush.bf16.msra.mxu1 %v1703_v12  ;;  %v1521_v52 = vld [vmem:[%s2761_s1 + $0x90] sm:$0xf]  ;;  %v1677_v53 = vld [vmem:[%s2761_s1 + $0x94] sm:$0xf0]  ;;  %v1523_v55 = vld [vmem:[%s2761_s1 + $0x98] sm:$0xf0]  ;;  %v1458_v58 = vor.u32 %v1661_v51, %v1457_v50 }
  0x24   : > { %726 = vmatpush.bf16.msra.mxu0 %v1694_v16  ;;  %1709 = vmatpush.bf16.msra.mxu2 %v1694_v16  ;;  %v1660_v56 = vld [vmem:[%s2761_s1 + $0x14] sm:$0xf]  ;;  %v1459_v57 = vld [vmem:[%s2761_s1 + $0x18] sm:$0xf0]  ;;  %v1522_v59 = vor.u32 %v1677_v53, %v1521_v52  ;;  %v1526_v60 = vor.u32 %v1676_v54, %v1523_v55  ;;  %v252_v63 = vld [vmem:[%s2762_s2 + $0xc8] sm:$0xff]  ;;  %p1883_p12 = pnand %p1882_p11, %p1993_p5  ;;  %p1888_p2 = por %p1887_p1, %p1886_p0 }
  0x25   : > { %349 = vperm.xlu2 %1764, %v235_v13   ;;  %1717 = vmatpush.bf16.msra.mxu3 %v1702_v17  ;;  %v1462_v61 = vor.u32 %v1660_v56, %v1459_v57  ;;  %v253_v62 = vld [vmem:[%s2762_s2 + $0xd0] sm:$0xff]  ;;  %v251_v0 = vld [vmem:[%s2762_s2 + $0xc0] sm:$0xff]  ;;  %v256_v1 = vld [vmem:[%s2762_s2 + $0xe8] sm:$0xff] }
  0x26   : > { %344 = vperm.xlu1 %1763, %v234_v14   ;;  %339 = vperm.xlu0 %1762, %v233_v15   ;;  %v255_v2 = vld [vmem:[%s2762_s2 + $0xe0] sm:$0xff]  ;;  %v254_v3 = vld [vmem:[%s2762_s2 + $0xd8] sm:$0xff]  ;;  %v1663_v5 = vld [vmem:[%s2761_s1 + $0x24] sm:$0xf0]  ;;  %p1884_p13 = pneg %p1883_p12 }
  0x27   : > { %815 = vmatpush.bf16.msra.mxu1 %v1702_v17  ;;  %v1465_v4 = vld [vmem:[%s2761_s1 + $0x20] sm:$0xf]  ;;  %v1679_v7 = vld [vmem:[%s2761_s1 + $0xa4] sm:$0xf0]  ;;  %v1678_v8 = vld [vmem:[%s2761_s1 + $0xa4] sm:$0xf] }
  0x28   : > { %727 = vmatpush.bf16.msra.mxu0 %v1693_v18  ;;  %1710 = vmatpush.bf16.msra.mxu2 %v1693_v18  ;;  %v1529_v6 = vld [vmem:[%s2761_s1 + $0xa0] sm:$0xf]  ;;  %v1531_v9 = vld [vmem:[%s2761_s1 + $0xa8] sm:$0xf0]  ;;  %v1662_v10 = vld [vmem:[%s2761_s1 + $0x24] sm:$0xf]  ;;  %v1466_v12 = vor.u32 %v1663_v5, %v1465_v4  ;;  %p1889_p3 = pnand %p1888_p2, %p1884_p13 }
  0x29   : > { %1718 = vmatpush.bf16.msra.mxu3 %v1701_v19  ;;  %v1467_v11 = vld [vmem:[%s2761_s1 + $0x28] sm:$0xf0]  ;;  %v1530_v13 = vor.u32 %v1679_v7, %v1529_v6  ;;  %v1534_v14 = vor.u32 %v1678_v8, %v1531_v9  ;;  %v259_v16 = vld [vmem:[%s2763_s3] sm:$0xff]  ;;  %v258_v17 = vld [vmem:[%s2762_s2 + $0xf8] sm:$0xff] }
  0x2a   : > { %v1470_v15 = vor.u32 %v1662_v10, %v1467_v11  ;;  %v257_v18 = vld [vmem:[%s2762_s2 + $0xf0] sm:$0xff]  ;;  %v264_v35 = vld [vmem:[%s2763_s3 + $0x28] sm:$0xff]  ;;  %v263_v36 = vld [vmem:[%s2763_s3 + $0x20] sm:$0xff] }
  0x2b   : > { %816 = vmatpush.bf16.msra.mxu1 %v1701_v19  ;;  %v262_v19 = vld [vmem:[%s2763_s3 + $0x18] sm:$0xff]  ;;  %v241_v37 = vld [vmem:[%s2762_s2 + $0x70] sm:$0xff]  ;;  %v240_v39 = vld [vmem:[%s2762_s2 + $0x68] sm:$0xff] }
  0x2c   : > { %728 = vmatpush.bf16.msra.mxu0 %v1692_v23  ;;  %1711 = vmatpush.bf16.msra.mxu2 %v1692_v23  ;;  %v1665_v23 = vld [vmem:[%s2761_s1 + $0x34] sm:$0xf0]  ;;  %v268_v52 = vld [vmem:[%s2763_s3 + $0x48] sm:$0xff]  ;;  %v267_v54 = vld [vmem:[%s2763_s3 + $0x40] sm:$0xff] }
  0x2d   : > { %364 = vperm.xlu2 %1764, %v238_v20   ;;  %1719 = vmatpush.bf16.msra.mxu3 %v1700_v24  ;;  %v261_v20 = vld [vmem:[%s2763_s3 + $0x10] sm:$0xff]  ;;  %v266_v38 = vld [vmem:[%s2763_s3 + $0x38] sm:$0xff]  ;;  %v271_v55 = vld [vmem:[%s2763_s3 + $0x60] sm:$0xff] }
  0x2e   : > { %359 = vperm.xlu1 %1763, %v237_v21   ;;  %354 = vperm.xlu0 %1762, %v236_v22   ;;  %v260_v21 = vld [vmem:[%s2763_s3 + $0x8] sm:$0xff]  ;;  %v1473_v22 = vld [vmem:[%s2761_s1 + $0x30] sm:$0xf]  ;;  %v242_v53 = vld [vmem:[%s2762_s2 + $0x78] sm:$0xff] }
  0x2f   : > { %817 = vmatpush.bf16.msra.mxu1 %v1700_v24  ;;  %v1537_v24 = vld [vmem:[%s2761_s1 + $0xb0] sm:$0xf]  ;;  %v1474_v30 = vor.u32 %v1665_v23, %v1473_v22  ;;  %v270_v56 = vld [vmem:[%s2763_s3 + $0x58] sm:$0xff]  ;;  %v272_v10 = vld [vmem:[%s2763_s3 + $0x68] sm:$0xff] }
  0x30   : > { %729 = vmatpush.bf16.msra.mxu0 %v1691_v25  ;;  %1712 = vmatpush.bf16.msra.mxu2 %v1691_v25  ;;  %v1681_v25 = vld [vmem:[%s2761_s1 + $0xb4] sm:$0xf0]  ;;  %v269_v57 = vld [vmem:[%s2763_s3 + $0x50] sm:$0xff] }
  0x31   : > { %1720 = vmatpush.bf16.msra.mxu3 %v1699_v26  ;;  %v274_v7 = vld [vmem:[%s2763_s3 + $0x78] sm:$0xff]  ;;  %v273_v9 = vld [vmem:[%s2763_s3 + $0x70] sm:$0xff] }
  0x33   : > { %818 = vmatpush.bf16.msra.mxu1 %v1699_v26  ;;  %v1680_v26 = vld [vmem:[%s2761_s1 + $0xb4] sm:$0xf] }
  0x34   : > { %730 = vmatpush.bf16.msra.mxu0 %v1690_v31  ;;  %1713 = vmatpush.bf16.msra.mxu2 %v1690_v31  ;;  %v1538_v31 = vor.u32 %v1681_v25, %v1537_v24 }
  0x35   : > { %394 = vperm.xlu2 %1764, %v244_v27   ;;  %1721 = vmatpush.bf16.msra.mxu3 %v1698_v34  ;;  %v1539_v27 = vld [vmem:[%s2761_s1 + $0xb8] sm:$0xf0] }
  0x36   : > { %389 = vperm.xlu1 %1763, %v243_v28   ;;  %369 = vperm.xlu0 %1762, %v239_v29   ;;  %v1664_v28 = vld [vmem:[%s2761_s1 + $0x34] sm:$0xf]  ;;  %v1475_v29 = vld [vmem:[%s2761_s1 + $0x38] sm:$0xf0]  ;;  %v1542_v32 = vor.u32 %v1680_v26, %v1539_v27 }
  0x37   : > { %819 = vmatpush.bf16.msra.mxu1 %v1698_v34  ;;  %731 = vmatmul.bf16.vlgmr.msra.gmra.mxu0 %v1450_v40  ;;  %v1478_v33 = vor.u32 %v1664_v28, %v1475_v29  ;;  %v265_v34 = vld [vmem:[%s2763_s3 + $0x30] sm:$0xff]  ;;  %v1481_v40 = vld [vmem:[%s2761_s1 + $0x40] sm:$0xf] }
  0x38   : > { %771 = vmatmul.bf16.vlgmr.msra.gmra.mxu2 %v1514_v41  ;;  %860 = vmatmul.bf16.vlgmr.msra.gmra.mxu3 %v1518_v42  ;;  %v1667_v41 = vld [vmem:[%s2761_s1 + $0x44] sm:$0xf0]  ;;  %v1545_v42 = vld [vmem:[%s2761_s1 + $0xc0] sm:$0xf] }
  0x3a   : > { %820 = vmatmul.bf16.vlgmr.msra.gmra.mxu1 %v1454_v43  ;;  %v1683_v43 = vld [vmem:[%s2761_s1 + $0xc4] sm:$0xf0] }
  0x3d   : > { %409 = vperm.xlu2 %1764, %v247_v44   ;;  %v1682_v44 = vld [vmem:[%s2761_s1 + $0xc4] sm:$0xf] }
  0x3e   : > { %404 = vperm.xlu1 %1763, %v246_v45   ;;  %399 = vperm.xlu0 %1762, %v245_v46   ;;  %v1547_v45 = vld [vmem:[%s2761_s1 + $0xc8] sm:$0xf0]  ;;  %v1666_v46 = vld [vmem:[%s2761_s1 + $0x44] sm:$0xf] }
  0x3f   : > { %v1550_v50 = vor.u32 %v1682_v44, %v1547_v45 }
  0x45   : > { %424 = vperm.xlu2 %1764, %v250_v47   ;;  %v1483_v47 = vld [vmem:[%s2761_s1 + $0x48] sm:$0xf0] }
  0x46   : > { %419 = vperm.xlu1 %1763, %v249_v48   ;;  %414 = vperm.xlu0 %1762, %v248_v49   ;;  %v1482_v48 = vor.u32 %v1667_v41, %v1481_v40  ;;  %v1546_v49 = vor.u32 %v1683_v43, %v1545_v42  ;;  %v1486_v51 = vor.u32 %v1666_v46, %v1483_v47 }
  0x47   : > { %736 = vmatmul.bf16.gmra.mxu0 %v1458_v58  ;;  %v1489_v58 = vld [vmem:[%s2761_s1 + $0x50] sm:$0xf] }
  0x48   : > { %776 = vmatmul.bf16.gmra.mxu2 %v1522_v59  ;;  %865 = vmatmul.bf16.gmra.mxu3 %v1526_v60  ;;  %v1669_v59 = vld [vmem:[%s2761_s1 + $0x54] sm:$0xf0]  ;;  %v1553_v60 = vld [vmem:[%s2761_s1 + $0xd0] sm:$0xf] }
  0x4a   : > { %825 = vmatmul.bf16.gmra.mxu1 %v1462_v61  ;;  %v1685_v61 = vld [vmem:[%s2761_s1 + $0xd4] sm:$0xf0] }
  0x4d   : > { %439 = vperm.xlu2 %1764, %v253_v62   ;;  %v1684_v62 = vld [vmem:[%s2761_s1 + $0xd4] sm:$0xf] }
  0x4e   : > { %434 = vperm.xlu1 %1763, %v252_v63   ;;  %429 = vperm.xlu0 %1762, %v251_v0   ;;  %v1555_v63 = vld [vmem:[%s2761_s1 + $0xd8] sm:$0xf0]  ;;  %v1668_v0 = vld [vmem:[%s2761_s1 + $0x54] sm:$0xf] }
  0x4f   : > { %v1558_v4 = vor.u32 %v1684_v62, %v1555_v63 }
  0x55   : > { %454 = vperm.xlu2 %1764, %v256_v1   ;;  %v1491_v1 = vld [vmem:[%s2761_s1 + $0x58] sm:$0xf0] }
  0x56   : > { %449 = vperm.xlu1 %1763, %v255_v2   ;;  %444 = vperm.xlu0 %1762, %v254_v3   ;;  %v1490_v2 = vor.u32 %v1669_v59, %v1489_v58  ;;  %v1554_v3 = vor.u32 %v1685_v61, %v1553_v60  ;;  %v1494_v5 = vor.u32 %v1668_v0, %v1491_v1 }
  0x57   : > { %741 = vmatmul.bf16.gmra.mxu0 %v1466_v12 }
  0x58   : > { %781 = vmatmul.bf16.gmra.mxu2 %v1530_v13  ;;  %870 = vmatmul.bf16.gmra.mxu3 %v1534_v14  ;;  %v1497_v13 = vld [vmem:[%s2761_s1 + $0x60] sm:$0xf]  ;;  %v1671_v14 = vld [vmem:[%s2761_s1 + $0x64] sm:$0xf0] }
  0x59   : > { %v1498_v23 = vor.u32 %v1671_v14, %v1497_v13 }
  0x5a   : > { %830 = vmatmul.bf16.gmra.mxu1 %v1470_v15  ;;  %v1561_v15 = vld [vmem:[%s2761_s1 + $0xe0] sm:$0xf] }
  0x5d   : > { %1239 = vperm.xlu2 %1764, %v259_v16   ;;  %v1687_v16 = vld [vmem:[%s2761_s1 + $0xe4] sm:$0xf0] }
  0x5e   : > { %464 = vperm.xlu1 %1763, %v258_v17   ;;  %459 = vperm.xlu0 %1762, %v257_v18   ;;  %v1686_v17 = vld [vmem:[%s2761_s1 + $0xe4] sm:$0xf]  ;;  %v1563_v18 = vld [vmem:[%s2761_s1 + $0xe8] sm:$0xf0]  ;;  %v1562_v24 = vor.u32 %v1687_v16, %v1561_v15 }
  0x5f   : > { %v1566_v25 = vor.u32 %v1686_v17, %v1563_v18 }
  0x65   : > { %1254 = vperm.xlu2 %1764, %v262_v19   ;;  %v1670_v19 = vld [vmem:[%s2761_s1 + $0x64] sm:$0xf] }
  0x66   : > { %1249 = vperm.xlu1 %1763, %v261_v20   ;;  %1244 = vperm.xlu0 %1762, %v260_v21   ;;  %v1499_v20 = vld [vmem:[%s2761_s1 + $0x68] sm:$0xf0] }
  0x67   : > { %746 = vmatmul.bf16.gmra.mxu0 %v1474_v30  ;;  %v1502_v26 = vor.u32 %v1670_v19, %v1499_v20 }
  0x68   : > { %786 = vmatmul.bf16.gmra.mxu2 %v1538_v31  ;;  %875 = vmatmul.bf16.gmra.mxu3 %v1542_v32  ;;  %v1505_v31 = vld [vmem:[%s2761_s1 + $0x70] sm:$0xf]  ;;  %v1673_v32 = vld [vmem:[%s2761_s1 + $0x74] sm:$0xf0] }
  0x6a   : > { %835 = vmatmul.bf16.gmra.mxu1 %v1478_v33  ;;  %v1569_v33 = vld [vmem:[%s2761_s1 + $0xf0] sm:$0xf] }
  0x6d   : > { %1269 = vperm.xlu2 %1764, %v265_v34   ;;  %v1689_v34 = vld [vmem:[%s2761_s1 + $0xf4] sm:$0xf0] }
  0x6e   : > { %1264 = vperm.xlu1 %1763, %v264_v35   ;;  %1259 = vperm.xlu0 %1762, %v263_v36   ;;  %v1688_v35 = vld [vmem:[%s2761_s1 + $0xf4] sm:$0xf]  ;;  %v1571_v36 = vld [vmem:[%s2761_s1 + $0xf8] sm:$0xf0]  ;;  %v1570_v40 = vor.u32 %v1689_v34, %v1569_v33 }
  0x6f   : > { %v2316_v11 = vpop.permute.xlu2 %329  ;;  %v1574_v41 = vor.u32 %v1688_v35, %v1571_v36 }
  0x75   : > { %379 = vperm.xlu2 %1764, %v241_v37   ;;  %v1672_v37 = vld [vmem:[%s2761_s1 + $0x74] sm:$0xf] }
  0x76   : > { %1274 = vperm.xlu1 %1763, %v266_v38   ;;  %374 = vperm.xlu0 %1762, %v240_v39   ;;  %v1507_v38 = vld [vmem:[%s2761_s1 + $0x78] sm:$0xf0]  ;;  %v1506_v39 = vor.u32 %v1673_v32, %v1505_v31 }
  0x77   : > { %751 = vmatmul.bf16.gmra.mxu0 %v1482_v48  ;;  %v2344_v22 = vpop.permute.xlu2 %334  ;;  %v1510_v42 = vor.u32 %v1672_v37, %v1507_v38 }
  0x78   : > { %791 = vmatmul.bf16.gmra.mxu2 %v1546_v49  ;;  %880 = vmatmul.bf16.gmra.mxu3 %v1550_v50 }
  0x7a   : > { %840 = vmatmul.bf16.gmra.mxu1 %v1486_v51 }
  0x7d   : > { %1284 = vperm.xlu2 %1764, %v268_v52  }
  0x7e   : > { %384 = vperm.xlu1 %1763, %v242_v53   ;;  %1279 = vperm.xlu0 %1762, %v267_v54  }
  0x7f   : > { %v2350_v29 = vpop.permute.xlu2 %349 }
  0x85   : > { %1299 = vperm.xlu2 %1764, %v271_v55  }
  0x86   : > { %1294 = vperm.xlu1 %1763, %v270_v56   ;;  %1289 = vperm.xlu0 %1762, %v269_v57  }
  0x87   : > { %756 = vmatmul.bf16.gmra.mxu0 %v1490_v2  ;;  %v2380_v44 = vpop.permute.xlu2 %364 }
  0x88   : > { %v310_v6 = vpop.permute.xlu0 %309  ;;  %796 = vmatmul.bf16.gmra.mxu2 %v1554_v3  ;;  %v2308_v8 = vpop.permute.xlu1 %319  ;;  %885 = vmatmul.bf16.gmra.mxu3 %v1558_v4 }
  0x8a   : > { %845 = vmatmul.bf16.gmra.mxu1 %v1494_v5 }
  0x8d   : > { %1314 = vperm.xlu2 %1764, %v274_v7  }
  0x8e   : > { %1309 = vperm.xlu1 %1763, %v273_v9   ;;  %1304 = vperm.xlu0 %1762, %v272_v10  }
  0x8f   : > { %v395_v47 = vpop.permute.xlu2 %394 }
  0x90   : > { %v315_v12 = vpop.permute.xlu0 %314  ;;  %v2342_v21 = vpop.permute.xlu1 %324 }
  0x97   : > { %761 = vmatmul.bf16.gmra.mxu0 %v1498_v23  ;;  %v2384_v55 = vpop.permute.xlu2 %409 }
  0x98   : > { %v2346_v27 = vpop.permute.xlu0 %339  ;;  %801 = vmatmul.bf16.gmra.mxu2 %v1562_v24  ;;  %890 = vmatmul.bf16.gmra.mxu3 %v1566_v25  ;;  %v2348_v28 = vpop.permute.xlu1 %344 }
  0x9a   : > { %850 = vmatmul.bf16.gmra.mxu1 %v1502_v26 }
  0xa0   : > { %v2352_v30 = vpop.permute.xlu0 %354  ;;  %v2378_v43 = vpop.permute.xlu1 %359 }
  0xa7   : > { %766 = vmatmul.bf16.gmra.mxu0 %v1506_v39 }
  0xa8   : > { %806 = vmatmul.bf16.gmra.mxu2 %v1570_v40  ;;  %v2382_v45 = vpop.permute.xlu0 %369  ;;  %895 = vmatmul.bf16.gmra.mxu3 %v1574_v41  ;;  %v390_v46 = vpop.permute.xlu1 %389 }
  0xaa   : > { %855 = vmatmul.bf16.gmra.mxu1 %v1510_v42 }
  0xb0   : > { %v400_v48 = vpop.permute.xlu0 %399  ;;  %v405_v53 = vpop.permute.xlu1 %404 }
  0xb4   : > { %v732_v49 = vpop.f32.mrf.mxu0 }
  0xb5   : > { %v733_v50 = vadd.f32 %v732_v49, %v310_v6  ;;  %v2392_v6 = vpop.permute.xlu2 %424 }
  0xb7   : > { %v821_v51 = vpop.f32.mrf.mxu1 }
  0xb8   : > { %v822_v52 = vadd.f32 %v821_v51, %v733_v50  ;;  %v2386_v58 = vpop.permute.xlu0 %414  ;;  %v2390_v4 = vpop.permute.xlu1 %419 }
  0xbb   : > { %v772_v54 = vpop.f32.mrf.mxu2  ;;  %v861_v57 = vpop.f32.mrf.mxu3 }
  0xbc   : > { %v773_v56 = vadd.f32 %v772_v54, %v390_v46  ;;  %v734_v59 = vpop.f32.mrf.mxu0 }
  0xbd   : > { %v735_v61 = vadd.f32 %v734_v59, %v315_v12  ;;  %v2402_v31 = vpop.permute.xlu2 %439 }
  0xbe   : > { %v862_v60 = vadd.f32 %v861_v57, %v773_v56 }
  0xbf   : > { %v823_v62 = vpop.f32.mrf.mxu1 }
  0xc0   : > { %v1639_v63 = vmul.f32 -1.442695, %v862_v60  ;;  %v2388_v0 = vadd.f32 %v823_v62, %v735_v61  ;;  %v2395_v10 = vpop.permute.xlu0 %429  ;;  %v2400_v25 = vpop.permute.xlu1 %434 }
  0xc2   : > { %1765 = vpow2.f32 %v1639_v63 }
  0xc3   : > { %v774_v1 = vpop.f32.mrf.mxu2  ;;  %v863_v3 = vpop.f32.mrf.mxu3 }
  0xc4   : > { %v775_v2 = vadd.f32 %v774_v1, %v395_v47  ;;  %v737_v5 = vpop.f32.mrf.mxu0 }
  0xc5   : > { %v738_v9 = vadd.f32 %v737_v5, %v2308_v8  ;;  %v2415_v61 = vpop.permute.xlu2 %454 }
  0xc6   : > { %v864_v7 = vadd.f32 %v863_v3, %v775_v2 }
  0xc7   : > { %v826_v13 = vpop.f32.mrf.mxu1 }
  0xc8   : > { %v1766_v12 = vpop.eup %1765  ;;  %v1640_v14 = vmul.f32 -1.442695, %v864_v7  ;;  %v2397_v15 = vadd.f32 %v826_v13, %v738_v9  ;;  %v2406_v36 = vpop.permute.xlu0 %444 }
  0xc9   : > { %v965_v16 = vadd.f32 1.0, %v1766_v12 }
  0xca   : > { %1767 = vpow2.f32 %v1640_v14 }
  0xcb   : > { %1769 = vrcp.f32 %v965_v16  ;;  %v777_v17 = vpop.f32.mrf.mxu2  ;;  %v866_v19 = vpop.f32.mrf.mxu3  ;;  %v992_v41 = vand.u32 2147483648, %v965_v16  ;;  %v990_v49 = vand.u32 2147483647, %v965_v16  ;;  %vm986_vm1 = vweird.f32 %v965_v16 }
  0xcc   : > { %v778_v18 = vadd.f32 %v777_v17, %v400_v48  ;;  %v739_v20 = vpop.f32.mrf.mxu0 }
  0xcd   : > { %v740_v24 = vadd.f32 %v739_v20, %v2342_v21  ;;  %vm991_vm3 = vcmp.eq.f32.partialorder %v990_v49, 8.507059e+37 }
  0xce   : > { %v867_v23 = vadd.f32 %v866_v19, %v778_v18 }
  0xcf   : > { %v828_v8 = vpop.f32.mrf.mxu1 }
  0xd0   : > { %v1768_v26 = vpop.eup %1767  ;;  %v1641_v32 = vmul.f32 -1.442695, %v867_v23  ;;  %v2404_v33 = vadd.f32 %v828_v8, %v740_v24  ;;  %v2418_v1 = vpop.permute.xlu0 %459 }
  0xd1   : > { %v1770_v34 = vpop.eup %1769  ;;  %v966_v35 = vadd.f32 1.0, %v1768_v26 }
  0xd2   : > { %v982_v37 = vmul.f32 %v1770_v34, %v965_v16  ;;  %1771 = vpow2.f32 %v1641_v32  ;;  %vm987_vm0 = vweird.f32 %v1770_v34 }
  0xd3   : > { %1773 = vrcp.f32 %v966_v35  ;;  %v779_v38 = vpop.f32.mrf.mxu2  ;;  %v868_v40 = vpop.f32.mrf.mxu3  ;;  %vm988_vm2 = vmor %vm986_vm1, %vm987_vm0  ;;  %v1007_v13 = vand.u32 2147483648, %v966_v35  ;;  %v1005_v16 = vand.u32 2147483647, %v966_v35  ;;  %vm1001_vm5 = vweird.f32 %v966_v35 }
  0xd4   : > { %1775 = vtanh.f32 %v822_v52  ;;  %v983_v39 = vsub.f32 1.0, %v982_v37  ;;  %v780_v21 = vadd.f32 %v779_v38, %v405_v53  ;;  %v742_v42 = vpop.f32.mrf.mxu0  ;;  %v2411_v52 = vpop.permute.xlu1 %449 }
  0xd5   : > { %v743_v48 = vadd.f32 %v742_v42, %v2316_v11  ;;  %v993_v11 = vor.u32 1.1754944e-38, %v992_v41  ;;  %v1008_v26 = vor.u32 1.1754944e-38, %v1007_v13  ;;  %vm1006_vm7 = vcmp.eq.f32.partialorder %v1005_v16, 8.507059e+37  ;;  %v1240_v41 = vpop.permute.xlu2 %1239 }
  0xd6   : > { %v869_v46 = vadd.f32 %v868_v40, %v780_v21  ;;  %v984_v47 = vmul.f32 %v1770_v34, %v983_v39 }
  0xd7   : > { %v831_v50 = vpop.f32.mrf.mxu1 }
  0xd8   : > { %v1772_v51 = vpop.eup %1771  ;;  %v1642_v54 = vmul.f32 -1.442695, %v869_v46  ;;  %v985_v56 = vadd.f32 %v1770_v34, %v984_v47  ;;  %v2409_v57 = vadd.f32 %v831_v50, %v743_v48  ;;  %v1245_v47 = vpop.permute.xlu0 %1244 }
  0xd9   : > { %v1774_v59 = vpop.eup %1773  ;;  %v2413_v53 = vadd.f32 1.0, %v1772_v51 }
  0xda   : > { %v1776_v60 = vpop.eup %1775  ;;  %1777 = vpow2.f32 %v1642_v54  ;;  %v989_v62 = vsel %vm988_vm2, %v1770_v34, %v985_v56  ;;  %v997_v63 = vmul.f32 %v1774_v59, %v966_v35  ;;  %vm1002_vm4 = vweird.f32 %v1774_v59 }
  0xdb   : > { %1779 = vrcp.f32 %v2413_v53  ;;  %v782_v2 = vpop.f32.mrf.mxu2  ;;  %v994_v3 = vsel %vm991_vm3, %v993_v11, %v989_v62  ;;  %v871_v9 = vpop.f32.mrf.mxu3  ;;  %vm1003_vm6 = vmor %vm1001_vm5, %vm1002_vm4  ;;  %v1020_v42 = vand.u32 2147483647, %v2413_v53  ;;  %v1022_v46 = vand.u32 2147483648, %v2413_v53 }
  0xdc   : > { %v998_v5 = vsub.f32 1.0, %v997_v63  ;;  %v783_v7 = vadd.f32 %v782_v2, %v2384_v55  ;;  %1781 = vtanh.f32 %v2388_v0  ;;  %v1221_v12 = vmul.f32 %v1776_v60, %v994_v3  ;;  %v2422_v18 = vpop.f32.mrf.mxu0  ;;  %v2427_v37 = vpop.permute.xlu1 %464 }
  0xdd   : > { %vm1016_vm9 = vweird.f32 %v2413_v53  ;;  %v1023_v62 = vor.u32 1.1754944e-38, %v1022_v46  ;;  %vm1021_vm11 = vcmp.eq.f32.partialorder %v1020_v42, 8.507059e+37 }
  0xde   : > { %v999_v14 = vmul.f32 %v1774_v59, %v998_v5  ;;  %v872_v17 = vadd.f32 %v871_v9, %v783_v7  ;;  %v1317_v49 = vmul.f32 %v1240_v41, %v1221_v12 }
  0xdf   : > { %v2425_v0 = vpop.f32.mrf.mxu1 }
  0xe0   : > { %v1778_v19 = vpop.eup %1777  ;;  %v1000_v20 = vadd.f32 %v1774_v59, %v999_v14  ;;  %v1643_v23 = vmul.f32 -1.442695, %v872_v17 }
  0xe1   : > { %v1780_v24 = vpop.eup %1779  ;;  %v968_v8 = vadd.f32 1.0, %v1778_v19 }
  0xe2   : > { %v1012_v55 = vmul.f32 %v1780_v24, %v2413_v53  ;;  %v1004_v32 = vsel %vm1003_vm6, %v1774_v59, %v1000_v20  ;;  %1783 = vpow2.f32 %v1643_v23  ;;  %v1782_v34 = vpop.eup %1781  ;;  %vm1017_vm8 = vweird.f32 %v1780_v24 }
  0xe3   : > { %1785 = vrcp.f32 %v968_v8  ;;  %v1009_v38 = vsel %vm1006_vm7, %v1008_v26, %v1004_v32  ;;  %v784_v39 = vpop.f32.mrf.mxu2  ;;  %v873_v40 = vpop.f32.mrf.mxu3  ;;  %vm1018_vm10 = vmor %vm1016_vm9, %vm1017_vm8  ;;  %v1037_v14 = vand.u32 2147483648, %v968_v8  ;;  %v1035_v20 = vand.u32 2147483647, %v968_v8 }
  0xe4   : > { %v1013_v21 = vsub.f32 1.0, %v1012_v55  ;;  %v1222_v35 = vmul.f32 %v1782_v34, %v1009_v38  ;;  %1787 = vtanh.f32 %v2397_v15  ;;  %v2433_v59 = vpop.f32.mrf.mxu0  ;;  %v1250_v53 = vpop.permute.xlu1 %1249  ;;  %v785_v16 = vadd.f32 %v784_v39, %v2386_v58 }
  0xe5   : > { %vm1031_vm13 = vweird.f32 %v968_v8  ;;  %v1038_v55 = vor.u32 1.1754944e-38, %v1037_v14  ;;  %vm1036_vm15 = vcmp.eq.f32.partialorder %v1035_v20, 8.507059e+37 }
  0xe6   : > { %v1014_v48 = vmul.f32 %v1780_v24, %v1013_v21  ;;  %v1318_v50 = vmul.f32 %v1245_v47, %v1222_v35  ;;  %v874_v32 = vadd.f32 %v873_v40, %v785_v16  ;;  %v1255_v47 = vpop.permute.xlu2 %1254 }
  0xe7   : > { %v2435_v13 = vpop.f32.mrf.mxu1 }
  0xe8   : > { %v1784_v51 = vpop.eup %1783  ;;  %v1015_v54 = vadd.f32 %v1780_v24, %v1014_v48  ;;  %v1333_v56 = vadd.f32 %v1318_v50, %v1317_v49  ;;  %v1644_v49 = vmul.f32 -1.442695, %v874_v32 }
  0xe9   : > { %v1786_v60 = vpop.eup %1785  ;;  %v969_v15 = vadd.f32 1.0, %v1784_v51 }
  0xea   : > { %v1027_v11 = vmul.f32 %v1786_v60, %v968_v8  ;;  %v1019_v63 = vsel %vm1018_vm10, %v1780_v24, %v1015_v54  ;;  %v1788_v2 = vpop.eup %1787  ;;  %vm1032_vm12 = vweird.f32 %v1786_v60 }
  0xeb   : > { %v1024_v3 = vsel %vm1021_vm11, %v1023_v62, %v1019_v63  ;;  %1789 = vrcp.f32 %v969_v15  ;;  %v787_v5 = vpop.f32.mrf.mxu2  ;;  %v876_v12 = vpop.f32.mrf.mxu3  ;;  %vm1033_vm14 = vmor %vm1031_vm13, %vm1032_vm12  ;;  %v1050_v8 = vand.u32 2147483647, %v969_v15  ;;  %v1052_v48 = vand.u32 2147483648, %v969_v15 }
  0xec   : > { %v1028_v7 = vsub.f32 1.0, %v1027_v11  ;;  %v1223_v9 = vmul.f32 %v1788_v2, %v1024_v3  ;;  %1791 = vtanh.f32 %v2404_v33  ;;  %v788_v33 = vadd.f32 %v787_v5, %v2390_v4  ;;  %v2440_v21 = vpop.f32.mrf.mxu0 }
  0xed   : > { %1793 = vtanh.f32 %v2409_v57  ;;  %vm1046_vm1 = vweird.f32 %v969_v15  ;;  %v1053_v62 = vor.u32 1.1754944e-38, %v1052_v48  ;;  %vm1051_vm3 = vcmp.eq.f32.partialorder %v1050_v8, 8.507059e+37 }
  0xee   : > { %v1319_v17 = vmul.f32 %v1250_v53, %v1223_v9  ;;  %v1029_v19 = vmul.f32 %v1786_v60, %v1028_v7  ;;  %v877_v51 = vadd.f32 %v876_v12, %v788_v33  ;;  %1795 = vpow2.f32 %v1644_v49  ;;  %v1260_v53 = vpop.permute.xlu0 %1259 }
  0xef   : > { %v2443_v54 = vpop.f32.mrf.mxu1 }
  0xf0   : > { %v1334_v23 = vadd.f32 %v1333_v56, %v1319_v17  ;;  %v1030_v24 = vadd.f32 %v1786_v60, %v1029_v19  ;;  %v1645_v57 = vmul.f32 -1.442695, %v877_v51 }
  0xf1   : > { %v1790_v26 = vpop.eup %1789 }
  0xf2   : > { %v1034_v34 = vsel %vm1033_vm14, %v1786_v60, %v1030_v24  ;;  %v1042_v38 = vmul.f32 %v1790_v26, %v969_v15  ;;  %v1792_v35 = vpop.eup %1791  ;;  %vm1047_vm0 = vweird.f32 %v1790_v26  ;;  %1797 = vpow2.f32 %v1645_v57 }
  0xf3   : > { %v1039_v58 = vsel %vm1036_vm15, %v1038_v55, %v1034_v34  ;;  %v789_v39 = vpop.f32.mrf.mxu2  ;;  %v878_v46 = vpop.f32.mrf.mxu3  ;;  %vm1048_vm2 = vmor %vm1046_vm1, %vm1047_vm0  ;;  %v745_v57 = vadd.f32 %v2422_v18, %v2344_v22 }
  0xf4   : > { %v1043_v41 = vsub.f32 1.0, %v1042_v38  ;;  %v1224_v42 = vmul.f32 %v1792_v35, %v1039_v58  ;;  %v790_v60 = vadd.f32 %v789_v39, %v2392_v6  ;;  %v1794_v63 = vpop.eup %1793  ;;  %v2446_v9 = vpop.f32.mrf.mxu0 }
  0xf5   : > { %v1796_v6 = vpop.eup %1795 }
  0xf6   : > { %v1044_v40 = vmul.f32 %v1790_v26, %v1043_v41  ;;  %v1320_v50 = vmul.f32 %v1255_v47, %v1224_v42  ;;  %v879_v7 = vadd.f32 %v878_v46, %v790_v60 }
  0xf7   : > { %v2451_v19 = vpop.f32.mrf.mxu1 }
  0xf8   : > { %v1045_v4 = vadd.f32 %v1790_v26, %v1044_v40  ;;  %v1335_v56 = vadd.f32 %v1334_v23, %v1320_v50  ;;  %v1646_v17 = vmul.f32 -1.442695, %v879_v7  ;;  %v2453_v23 = vadd.f32 1.0, %v1796_v6 }
  0xfa   : > { %v1049_v11 = vsel %vm1048_vm2, %v1790_v26, %v1045_v4  ;;  %v1798_v26 = vpop.eup %1797  ;;  %1799 = vpow2.f32 %v1646_v17  ;;  %vm1061_vm5 = vweird.f32 %v2453_v23 }
  0xfb   : > { %v1054_v2 = vsel %vm1051_vm3, %v1053_v62, %v1049_v11  ;;  %v792_v3 = vpop.f32.mrf.mxu2  ;;  %v881_v12 = vpop.f32.mrf.mxu3  ;;  %1801 = vrcp.f32 %v2453_v23 }
  0xfc   : > { %v1225_v5 = vmul.f32 %v1794_v63, %v1054_v2  ;;  %v793_v15 = vadd.f32 %v792_v3, %v2395_v10  ;;  %v2456_v34 = vpop.f32.mrf.mxu0  ;;  %v2458_v10 = vadd.f32 1.0, %v1798_v26  ;;  %v748_v2 = vadd.f32 %v2433_v59, %v2346_v27 }
  0xfe   : > { %v1321_v14 = vmul.f32 %v1260_v53, %v1225_v5  ;;  %v882_v20 = vadd.f32 %v881_v12, %v793_v15  ;;  %v834_v15 = vadd.f32 %v2425_v0, %v745_v57  ;;  %v837_v22 = vadd.f32 %v2435_v13, %v748_v2 }
  0xff   : > { %v2461_v35 = vpop.f32.mrf.mxu1  ;;  %vm1076_vm9 = vweird.f32 %v2458_v10 }
 0x100   : > { %v2449_v16 = vadd.f32 %v1335_v56, %v1321_v14  ;;  %v1647_v32 = vmul.f32 -1.442695, %v882_v20  ;;  %v1800_v33 = vpop.eup %1799 }
 0x101   : > { %v2464_v41 = vpop.eup %1801  ;;  %v2467_v47 = vadd.f32 1.0, %v1800_v33 }
 0x102   : > { %1803 = vpow2.f32 %v1647_v32  ;;  %v1057_v48 = vmul.f32 %v2464_v41, %v2453_v23  ;;  %vm1062_vm4 = vweird.f32 %v2464_v41 }
 0x103   : > { %v794_v24 = vpop.f32.mrf.mxu2  ;;  %v883_v55 = vpop.f32.mrf.mxu3  ;;  %1805 = vrcp.f32 %v2458_v10  ;;  %vm2509_vm6 = vmor %vm1061_vm5, %vm1062_vm4  ;;  %vm1091_vm13 = vweird.f32 %v2467_v47 }
 0x104   : > { %v795_v38 = vadd.f32 %v794_v24, %v2400_v25  ;;  %v2471_v40 = vpop.f32.mrf.mxu0  ;;  %1807 = vrcp.f32 %v2467_v47  ;;  %v1058_v4 = vsub.f32 1.0, %v1057_v48 }
 0x106   : > { %v884_v58 = vadd.f32 %v883_v55, %v795_v38  ;;  %v1059_v5 = vmul.f32 %v2464_v41, %v1058_v4  ;;  %v1065_v55 = vand.u32 2147483647, %v2453_v23 }
 0x107   : > { %v2480_v62 = vpop.f32.mrf.mxu1 }
 0x108   : > { %v1804_v8 = vpop.eup %1803  ;;  %v1648_v25 = vmul.f32 -1.442695, %v884_v58  ;;  %v1060_v59 = vadd.f32 %v2464_v41, %v1059_v5  ;;  %vm1066_vm8 = vcmp.eq.f32.partialorder %v1065_v55, 8.507059e+37 }
 0x109   : > { %v2473_v50 = vpop.eup %1805  ;;  %v2476_v51 = vadd.f32 1.0, %v1804_v8  ;;  %v1080_v8 = vand.u32 2147483647, %v2458_v10 }
 0x10a   : > { %1809 = vpow2.f32 %v1648_v25  ;;  %v1072_v60 = vmul.f32 %v2473_v50, %v2458_v10  ;;  %v2488_v3 = vpop.eup %1807  ;;  %v1064_v58 = vsel %vm2509_vm6, %v2464_v41, %v1060_v59  ;;  %vm1077_vm7 = vweird.f32 %v2473_v50 }
 0x10b   : > { %v797_v39 = vpop.f32.mrf.mxu2  ;;  %v886_v46 = vpop.f32.mrf.mxu3  ;;  %1811 = vrcp.f32 %v2476_v51  ;;  %v1087_v27 = vmul.f32 %v2488_v3, %v2467_v47  ;;  %v1082_v41 = vand.u32 2147483648, %v2458_v10  ;;  %vm2535_vm10 = vmor %vm1076_vm9, %vm1077_vm7  ;;  %vm1081_vm11 = vcmp.eq.f32.partialorder %v1080_v8, 8.507059e+37 }
 0x10c   : > { %v798_v42 = vadd.f32 %v797_v39, %v2402_v31  ;;  %v1073_v12 = vsub.f32 1.0, %v1072_v60  ;;  %v2497_v18 = vpop.f32.mrf.mxu0  ;;  %vm1092_vm12 = vweird.f32 %v2488_v3  ;;  %vm1106_vm1 = vweird.f32 %v2476_v51 }
 0x10d   : > { %v1088_v38 = vsub.f32 1.0, %v1087_v27  ;;  %v1083_v5 = vor.u32 1.1754944e-38, %v1082_v41  ;;  %vm2565_vm14 = vmor %vm1091_vm13, %vm1092_vm12  ;;  %v1110_v41 = vand.u32 2147483647, %v2476_v51 }
 0x10e   : > { %v887_v49 = vadd.f32 %v886_v46, %v798_v42  ;;  %v1074_v0 = vmul.f32 %v2473_v50, %v1073_v12 }
 0x10f   : > { %v2515_v33 = vpop.f32.mrf.mxu1  ;;  %vm1111_vm3 = vcmp.eq.f32.partialorder %v1110_v41, 8.507059e+37 }
 0x110   : > { %v1649_v31 = vmul.f32 -1.442695, %v887_v49  ;;  %v1810_v53 = vpop.eup %1809  ;;  %v1075_v42 = vadd.f32 %v2473_v50, %v1074_v0  ;;  %v1265_v0 = vpop.permute.xlu1 %1264 }
 0x111   : > { %v2501_v17 = vpop.eup %1811  ;;  %v2504_v20 = vadd.f32 1.0, %v1810_v53 }
 0x112   : > { %1813 = vpow2.f32 %v1649_v31  ;;  %v1079_v10 = vsel %vm2535_vm10, %v2473_v50, %v1075_v42  ;;  %v1095_v50 = vand.u32 2147483647, %v2467_v47  ;;  %vm1107_vm0 = vweird.f32 %v2501_v17 }
 0x113   : > { %v799_v56 = vpop.f32.mrf.mxu2  ;;  %v888_v11 = vpop.f32.mrf.mxu3  ;;  %vm2597_vm2 = vmor %vm1106_vm1, %vm1107_vm0  ;;  %vm1121_vm5 = vweird.f32 %v2504_v20 }
 0x114   : > { %v800_v63 = vadd.f32 %v799_v56, %v2406_v36  ;;  %v750_v36 = vadd.f32 %v2440_v21, %v2348_v28  ;;  %v1067_v28 = vand.u32 2147483648, %v2453_v23  ;;  %v1102_v23 = vmul.f32 %v2501_v17, %v2476_v51  ;;  %v2544_v57 = vpop.f32.mrf.mxu0 }
 0x115   : > { %vm1096_vm15 = vcmp.eq.f32.partialorder %v1095_v50, 8.507059e+37 }
 0x116   : > { %v889_v7 = vadd.f32 %v888_v11, %v800_v63  ;;  %v839_v32 = vadd.f32 %v2443_v54, %v750_v36  ;;  %v1068_v46 = vor.u32 1.1754944e-38, %v1067_v28  ;;  %v1103_v11 = vsub.f32 1.0, %v1102_v23 }
 0x117   : > { %v758_v36 = vadd.f32 %v2471_v40, %v2378_v43 }
 0x118   : > { %v1650_v14 = vmul.f32 -1.442695, %v889_v7  ;;  %v1814_v24 = vpop.eup %1813  ;;  %v1069_v49 = vsel %vm1066_vm8, %v1068_v46, %v1064_v58  ;;  %v1112_v58 = vand.u32 2147483648, %v2476_v51 }
 0x119   : > { %v2527_v54 = vadd.f32 1.0, %v1814_v24 }
 0x11a   : > { %1815 = vpow2.f32 %v1650_v14  ;;  %v1113_v51 = vor.u32 1.1754944e-38, %v1112_v58 }
 0x11b   : > { %v802_v6 = vpop.f32.mrf.mxu2  ;;  %v891_v13 = vpop.f32.mrf.mxu3  ;;  %1817 = vtanh.f32 %v834_v15  ;;  %vm1136_vm8 = vweird.f32 %v2527_v54 }
 0x11c   : > { %v803_v21 = vadd.f32 %v802_v6, %v2411_v52  ;;  %1819 = vtanh.f32 %v837_v22  ;;  %v753_v52 = vadd.f32 %v2446_v9, %v2350_v29  ;;  %v1089_v29 = vmul.f32 %v2488_v3, %v1088_v38 }
 0x11d   : > { %1821 = vrcp.f32 %v2504_v20  ;;  %v1084_v22 = vsel %vm1081_vm11, %v1083_v5, %v1079_v10 }
 0x11e   : > { %v892_v39 = vadd.f32 %v891_v13, %v803_v21  ;;  %1823 = vtanh.f32 %v839_v32  ;;  %v842_v31 = vadd.f32 %v2451_v19, %v753_v52  ;;  %v755_v19 = vadd.f32 %v2456_v34, %v2352_v30  ;;  %v2561_v34 = vpop.f32.mrf.mxu1 }
 0x11f   : > { %v1090_v53 = vadd.f32 %v2488_v3, %v1089_v29  ;;  %v1104_v30 = vmul.f32 %v2501_v17, %v1103_v11 }
 0x120   : > { %v1651_v48 = vmul.f32 -1.442695, %v892_v39  ;;  %v1816_v25 = vpop.eup %1815  ;;  %v844_v24 = vadd.f32 %v2461_v35, %v755_v19  ;;  %v847_v35 = vadd.f32 %v2480_v62, %v758_v36  ;;  %v1270_v39 = vpop.permute.xlu2 %1269 }
 0x121   : > { %v1818_v9 = vpop.eup %1817  ;;  %v2549_v7 = vadd.f32 1.0, %v1816_v25  ;;  %v1094_v28 = vsel %vm2565_vm14, %v2488_v3, %v1090_v53  ;;  %v1105_v38 = vadd.f32 %v2501_v17, %v1104_v30  ;;  %v764_v25 = vpop.f32.mrf.mxu0 }
 0x122   : > { %1825 = vpow2.f32 %v1651_v48  ;;  %v1820_v60 = vpop.eup %1819  ;;  %v1226_v14 = vmul.f32 %v1818_v9, %v1069_v49  ;;  %v760_v48 = vadd.f32 %v2497_v18, %v2380_v44  ;;  %v375_v49 = vpop.permute.xlu0 %374 }
 0x123   : > { %v804_v56 = vpop.f32.mrf.mxu2  ;;  %1827 = vrcp.f32 %v2527_v54  ;;  %v893_v2 = vpop.f32.mrf.mxu3  ;;  %v1227_v40 = vmul.f32 %v1820_v60, %v1084_v22  ;;  %v1109_v44 = vsel %vm2597_vm2, %v2501_v17, %v1105_v38  ;;  %v1127_v17 = vand.u32 2147483648, %v2504_v20 }
 0x124   : > { %v805_v63 = vadd.f32 %v804_v56, %v2415_v61  ;;  %v2551_v12 = vpop.eup %1821  ;;  %v1097_v61 = vand.u32 2147483648, %v2467_v47  ;;  %1829 = vtanh.f32 %v842_v31  ;;  %v1322_v26 = vmul.f32 %v1265_v0, %v1226_v14  ;;  %v1275_v53 = vpop.permute.xlu1 %1274 }
 0x125   : > { %v1824_v27 = vpop.eup %1823  ;;  %v1117_v43 = vmul.f32 %v2551_v12, %v2504_v20  ;;  %1831 = vrcp.f32 %v2549_v7  ;;  %v1323_v62 = vmul.f32 %v1270_v39, %v1227_v40  ;;  %v849_v5 = vadd.f32 %v2515_v33, %v760_v48 }
 0x126   : > { %v894_v15 = vadd.f32 %v893_v2, %v805_v63  ;;  %v1098_v55 = vor.u32 1.1754944e-38, %v1097_v61  ;;  %v1337_v9 = vadd.f32 %v2449_v16, %v1322_v26  ;;  %v1125_v2 = vand.u32 2147483647, %v2504_v20  ;;  %v853_v19 = vpop.f32.mrf.mxu1 }
 0x127   : > { %v1118_v42 = vsub.f32 1.0, %v1117_v43  ;;  %v1114_v50 = vsel %vm1111_vm3, %v1113_v51, %v1109_v44  ;;  %v763_v61 = vadd.f32 %v2544_v57, %v2382_v45  ;;  %vm1122_vm4 = vweird.f32 %v2551_v12 }
 0x128   : > { %v1652_v59 = vmul.f32 -1.442695, %v894_v15  ;;  %v1826_v6 = vpop.eup %1825  ;;  %v1099_v3 = vsel %vm1096_vm15, %v1098_v55, %v1094_v28  ;;  %v1338_v63 = vadd.f32 %v1337_v9, %v1323_v62  ;;  %vm2626_vm6 = vcmp.eq.f32.partialorder %v1125_v2, 8.507059e+37  ;;  %v380_v28 = vpop.permute.xlu2 %379  ;;  %vm2632_vm7 = vmor %vm1121_vm5, %vm1122_vm4 }
 0x129   : > { %v2573_v47 = vpop.eup %1827  ;;  %v2578_v21 = vadd.f32 1.0, %v1826_v6  ;;  %v1228_v56 = vmul.f32 %v1824_v27, %v1099_v3  ;;  %v1119_v18 = vmul.f32 %v2551_v12, %v1118_v42  ;;  %v1128_v13 = vor.u32 1.1754944e-38, %v1127_v17 }
 0x12a   : > { %1833 = vpow2.f32 %v1652_v59  ;;  %v1132_v23 = vmul.f32 %v2573_v47, %v2527_v54  ;;  %v1830_v8 = vpop.eup %1829  ;;  %v765_v43 = vadd.f32 %v764_v25, %v375_v49  ;;  %v852_v20 = vadd.f32 %v2561_v34, %v763_v61  ;;  %v1280_v38 = vpop.permute.xlu0 %1279 }
 0x12b   : > { %v807_v32 = vpop.f32.mrf.mxu2  ;;  %1835 = vrcp.f32 %v2578_v21  ;;  %v896_v52 = vpop.f32.mrf.mxu3  ;;  %v1324_v22 = vmul.f32 %v1275_v53, %v1228_v56  ;;  %v1120_v27 = vadd.f32 %v2551_v12, %v1119_v18  ;;  %v1229_v0 = vmul.f32 %v1830_v8, %v1114_v50 }
 0x12c   : > { %v808_v46 = vadd.f32 %v807_v32, %v2418_v1  ;;  %v2592_v29 = vpop.eup %1831  ;;  %1837 = vtanh.f32 %v844_v24  ;;  %v1133_v16 = vsub.f32 1.0, %v1132_v23  ;;  %vm1137_vm9 = vweird.f32 %v2573_v47 }
 0x12d   : > { %1839 = vtanh.f32 %v847_v35  ;;  %v1147_v15 = vmul.f32 %v2592_v29, %v2549_v7  ;;  %v1339_v26 = vadd.f32 %v1338_v63, %v1324_v22  ;;  %v767_v35 = vpop.f32.mrf.mxu0  ;;  %v1124_v58 = vsel %vm2632_vm7, %v2551_v12, %v1120_v27  ;;  %vm2658_vm10 = vmor %vm1136_vm8, %vm1137_vm9 }
 0x12e   : > { %v897_v1 = vadd.f32 %v896_v52, %v808_v46  ;;  %v1134_v30 = vmul.f32 %v2573_v47, %v1133_v16  ;;  %v1325_v42 = vmul.f32 %v1280_v38, %v1229_v0  ;;  %v1140_v23 = vand.u32 2147483647, %v2527_v54  ;;  %v856_v4 = vpop.f32.mrf.mxu1 }
 0x12f   : > { %v1148_v24 = vsub.f32 1.0, %v1147_v15  ;;  %v1142_v34 = vand.u32 2147483648, %v2527_v54  ;;  %v854_v62 = vadd.f32 %v853_v19, %v765_v43  ;;  %v1129_v48 = vsel %vm2626_vm6, %v1128_v13, %v1124_v58  ;;  %v385_v54 = vpop.permute.xlu1 %384 }
 0x130   : > { %v1834_v31 = vpop.eup %1833  ;;  %v1653_v10 = vmul.f32 -1.442695, %v897_v1  ;;  %v1135_v52 = vadd.f32 %v2573_v47, %v1134_v30  ;;  %v1157_v56 = vand.u32 2147483648, %v2549_v7  ;;  %v2669_v44 = vadd.f32 %v1339_v26, %v1325_v42  ;;  %v1285_v15 = vpop.permute.xlu2 %1284 }
 0x131   : > { %v2605_v60 = vadd.f32 1.0, %v1834_v31  ;;  %v2607_v11 = vpop.eup %1835  ;;  %v1149_v8 = vmul.f32 %v2592_v29, %v1148_v24  ;;  %v1155_v31 = vand.u32 2147483647, %v2549_v7  ;;  %vm1141_vm11 = vcmp.eq.f32.partialorder %v1140_v23, 8.507059e+37 }
 0x132   : > { %v1162_v36 = vmul.f32 %v2607_v11, %v2578_v21  ;;  %v1838_v33 = vpop.eup %1837  ;;  %v1139_v1 = vsel %vm2658_vm10, %v2573_v47, %v1135_v52  ;;  %v1143_v51 = vor.u32 1.1754944e-38, %v1142_v34  ;;  %v768_v18 = vadd.f32 %v767_v35, %v380_v28  ;;  %v1290_v43 = vpop.permute.xlu0 %1289 }
 0x133   : > { %1841 = vrcp.f32 %v2605_v60  ;;  %v809_v14 = vpop.f32.mrf.mxu2  ;;  %v2623_v6 = vpop.eup %1839  ;;  %v1150_v16 = vadd.f32 %v2592_v29, %v1149_v8  ;;  %vm1152_vm12 = vweird.f32 %v2592_v29  ;;  %v1230_v47 = vmul.f32 %v1838_v33, %v1129_v48 }
 0x134   : > { %1843 = vpow2.f32 %v1653_v10  ;;  %v810_v59 = vadd.f32 %v809_v14, %v2427_v37  ;;  %v898_v57 = vpop.f32.mrf.mxu3  ;;  %v1163_v55 = vsub.f32 1.0, %v1162_v36  ;;  %v1144_v63 = vsel %vm1141_vm11, %v1143_v51, %v1139_v1 }
 0x135   : > { %1845 = vtanh.f32 %v849_v5  ;;  %vm1167_vm13 = vweird.f32 %v2607_v11  ;;  %vm1151_vm14 = vweird.f32 %v2549_v7  ;;  %vm2677_vm15 = vcmp.eq.f32.partialorder %v1155_v31, 8.507059e+37  ;;  %v769_v36 = vpop.f32.mrf.mxu0 }
 0x136   : > { %v899_v40 = vadd.f32 %v898_v57, %v810_v59  ;;  %v1164_v9 = vmul.f32 %v2607_v11, %v1163_v55  ;;  %v1158_v53 = vor.u32 1.1754944e-38, %v1157_v56  ;;  %v1172_v50 = vand.u32 2147483648, %v2578_v21  ;;  %vm2682_vm0 = vmor %vm1151_vm14, %vm1152_vm12  ;;  %v858_v37 = vpop.f32.mrf.mxu1 }
 0x137   : > { %vm1166_vm1 = vweird.f32 %v2578_v21  ;;  %v1170_v22 = vand.u32 2147483647, %v2578_v21  ;;  %v857_v61 = vadd.f32 %v856_v4, %v768_v18  ;;  %v1231_v27 = vmul.f32 %v2623_v6, %v1144_v63  ;;  %v1295_v35 = vpop.permute.xlu1 %1294 }
 0x138   : > { %v1654_v39 = vmul.f32 -1.442695, %v899_v40  ;;  %v1165_v2 = vadd.f32 %v2607_v11, %v1164_v9  ;;  %v1154_v30 = vsel %vm2682_vm0, %v2592_v29, %v1150_v16  ;;  %vm2696_vm2 = vmor %vm1166_vm1, %vm1167_vm13  ;;  %v1187_v6 = vand.u32 2147483648, %v2605_v60  ;;  %v1300_v48 = vpop.permute.xlu2 %1299 }
 0x139   : > { %v2638_v32 = vpop.eup %1841  ;;  %v1173_v57 = vor.u32 1.1754944e-38, %v1172_v50  ;;  %vm1181_vm4 = vweird.f32 %v2605_v60  ;;  %v1185_v13 = vand.u32 2147483647, %v2605_v60  ;;  %v770_v24 = vadd.f32 %v769_v36, %v385_v54 }
 0x13a   : > { %v1844_v3 = vpop.eup %1843  ;;  %v1177_v46 = vmul.f32 %v2638_v32, %v2605_v60  ;;  %1847 = vpow2.f32 %v1654_v39  ;;  %vm1182_vm3 = vweird.f32 %v2638_v32  ;;  %v1169_v21 = vsel %vm2696_vm2, %v2607_v11, %v1165_v2 }
 0x13b   : > { %v2650_v41 = vadd.f32 1.0, %v1844_v3  ;;  %v2652_v12 = vpop.eup %1845  ;;  %1849 = vtanh.f32 %v852_v20  ;;  %v1326_v40 = vmul.f32 %v1285_v15, %v1230_v47  ;;  %v1159_v28 = vsel %vm2677_vm15, %v1158_v53, %v1154_v30  ;;  %vm2712_vm6 = vmor %vm1181_vm4, %vm1182_vm3 }
 0x13c   : > { %v1178_v49 = vsub.f32 1.0, %v1177_v46  ;;  %vm1171_vm5 = vcmp.eq.f32.partialorder %v1170_v22, 8.507059e+37  ;;  %v1188_v38 = vor.u32 1.1754944e-38, %v1187_v6  ;;  %v1327_v39 = vmul.f32 %v1290_v43, %v1231_v27 }
 0x13d   : > { %1851 = vrcp.f32 %v2650_v41  ;;  %v1174_v20 = vsel %vm1171_vm5, %v1173_v57, %v1169_v21  ;;  %v1202_v60 = vand.u32 2147483648, %v2650_v41  ;;  %v1200_v52 = vand.u32 2147483647, %v2650_v41 }
 0x13e   : > { %1853 = vtanh.f32 %v854_v62  ;;  %v1179_v10 = vmul.f32 %v2638_v32, %v1178_v49  ;;  %v1232_v3 = vmul.f32 %v2652_v12, %v1159_v28  ;;  %vm1186_vm8 = vcmp.eq.f32.partialorder %v1185_v13, 8.507059e+37 }
 0x13f   : > { %v859_v42 = vadd.f32 %v858_v37, %v770_v24  ;;  %vm1196_vm9 = vweird.f32 %v2650_v41  ;;  %v1341_v25 = vadd.f32 %v2669_v44, %v1326_v40  ;;  %vm1201_vm11 = vcmp.eq.f32.partialorder %v1200_v52, 8.507059e+37  ;;  %v1310_v2 = vpop.permute.xlu1 %1309 }
 0x140   : > { %v1848_v5 = vpop.eup %1847  ;;  %v1180_v0 = vadd.f32 %v2638_v32, %v1179_v10  ;;  %v1328_v4 = vmul.f32 %v1295_v35, %v1232_v3  ;;  %v1305_v10 = vpop.permute.xlu0 %1304  ;;  %v1356_v6 = vlaneseq  ;;  %vm1360_vm1 = vcmask 1040384  }
 0x141   : > { %v1850_v17 = vpop.eup %1849  ;;  %v2688_v7 = vadd.f32 1.0, %v1848_v5  ;;  %v1342_v56 = vadd.f32 %v1341_v25, %v1327_v39 }
 0x142   : > { %v1184_v55 = vsel %vm2712_vm6, %v2638_v32, %v1180_v0  ;;  %v1233_v34 = vmul.f32 %v1850_v17, %v1174_v20  ;;  %v1203_v32 = vor.u32 1.1754944e-38, %v1202_v60 }
 0x143   : > { %v1852_v33 = vpop.eup %1851  ;;  %1855 = vrcp.f32 %v2688_v7  ;;  %v1189_v46 = vsel %vm1186_vm8, %v1188_v38, %v1184_v55  ;;  %v1217_v51 = vand.u32 2147483648, %v2688_v7  ;;  %v1215_v16 = vand.u32 2147483647, %v2688_v7 }
 0x144   : > { %v1192_v45 = vmul.f32 %v1852_v33, %v2650_v41  ;;  %v1854_v29 = vpop.eup %1853  ;;  %1857 = vtanh.f32 %v857_v61  ;;  %vm1197_vm7 = vweird.f32 %v1852_v33  ;;  %v1329_v54 = vmul.f32 %v1300_v48, %v1233_v34  ;;  %v1315_v61 = vpop.permute.xlu2 %1314 }
 0x145   : > { %vm1198_vm10 = vmor %vm1196_vm9, %vm1197_vm7  ;;  %v1234_v12 = vmul.f32 %v1854_v29, %v1189_v46  ;;  %1859 = vtanh.f32 %v859_v42  ;;  %v1343_v47 = vadd.f32 %v1342_v56, %v1328_v4  ;;  %vm1211_vm13 = vweird.f32 %v2688_v7 }
 0x146   : > { %v1193_v26 = vsub.f32 1.0, %v1192_v45  ;;  %v1218_v5 = vor.u32 1.1754944e-38, %v1217_v51  ;;  %vm1216_vm15 = vcmp.eq.f32.partialorder %v1215_v16, 8.507059e+37  ;;  %v1357_v29 = vand.u32 127, %v1356_v6 }
 0x147   : > { %v1330_v44 = vmul.f32 %v1305_v10, %v1234_v12  ;;  %v1344_v19 = vadd.f32 %v1343_v47, %v1329_v54 }
 0x148   : > { %v1194_v58 = vmul.f32 %v1852_v33, %v1193_v26  ;;  %vm1358_vm0 = vcmp.lt.s32.totalorder %v1357_v29, 64 }
 0x149   : > { %v1856_v23 = vpop.eup %1855  ;;  %v1345_v14 = vadd.f32 %v1344_v19, %v1330_v44 }
 0x14a   : > { %v1195_v8 = vadd.f32 %v1852_v33, %v1194_v58  ;;  %v1207_v62 = vmul.f32 %v1856_v23, %v2688_v7  ;;  %v1858_v49 = vpop.eup %1857  ;;  %vm1212_vm12 = vweird.f32 %v1856_v23 }
 0x14b   : > { %vm1213_vm14 = vmor %vm1211_vm13, %vm1212_vm12  ;;  %v1860_v17 = vpop.eup %1859 }
 0x14c   : > { %v1199_v9 = vsel %vm1198_vm10, %v1852_v33, %v1195_v8  ;;  %v1208_v31 = vsub.f32 1.0, %v1207_v62 }
 0x14d   : > { %v1204_v1 = vsel %vm1201_vm11, %v1203_v32, %v1199_v9 }
 0x14e   : > { %v1235_v41 = vmul.f32 %v1858_v49, %v1204_v1  ;;  %v1209_v18 = vmul.f32 %v1856_v23, %v1208_v31 }
 0x150   : > { %v1210_v63 = vadd.f32 %v1856_v23, %v1209_v18  ;;  %v1331_v53 = vmul.f32 %v1310_v2, %v1235_v41 }
 0x152   : > { %v1214_v50 = vsel %vm1213_vm14, %v1856_v23, %v1210_v63  ;;  %v1346_v36 = vadd.f32 %v1345_v14, %v1331_v53 }
 0x153   : > { %v1219_v15 = vsel %vm1216_vm15, %v1218_v5, %v1214_v50 }
 0x154   : > { %v1236_v22 = vmul.f32 %v1860_v17, %v1219_v15 }
 0x156   : > { %v1332_v33 = vmul.f32 %v1315_v61, %v1236_v22 }
 0x158   : > { %v1347_v27 = vadd.f32 %v1346_v36, %v1332_v33 }
 0x15a   : > { %v1348_v30 = vrot.slane %v1347_v27, 4 }
 0x15c   : > { %v1349_v59 = vadd.f32 %v1348_v30, %v1347_v27 }
 0x15e   : > { %v1350_v0 = vrot.slane %v1349_v59, 2 }
 0x160   : > { %v1351_v21 = vadd.f32 %v1350_v0, %v1349_v59 }
 0x162   : > { %v1352_v7 = vrot.slane %v1351_v21, 1 }
 0x164   : > { %v1353_v45 = vadd.f32 %v1352_v7, %v1351_v21 }
 0x166   : > { %1354 = vst [vmem:[#allocation2] sm:$0x1] %v1353_v45 }
 0x16d   : > { %v1355_v57 = vld [vmem:[#allocation2] sm:$0x1] }
 0x16e   : > { %v1359_v13 = vsel %vm1358_vm0, %v1355_v57, -inf }
 0x16f   : > { %v1361_v24 = vsel %vm1360_vm1, %v1359_v13, -inf }
 0x170   : > { %1362 = vmax.xlane.f32.xlu0 %v1361_v24 }
 0x1e3   : > { %v1363_v43 = vpop.xlane.xlu0 %1362 }
 0x1e4   : > { %v1364_v40 = vsub.f32 %v1359_v13, %v1363_v43 }
 0x1e6   : > { %v1365_v28 = vmul.f32 1.442695, %v1364_v40 }
 0x1e8   : > { %1861 = vpow2.f32 %v1365_v28 }
 0x1ee   : > { %v1862_v11 = vpop.eup %1861 }
 0x1ef   : > { %v1367_v26 = vsel %vm1360_vm1, %v1862_v11, 0.0 }
 0x1f0   : > { %1368 = vadd.xlane.f32.xlu1 %v1367_v26 }
 0x263   : > { %v1369_v37 = vpop.xlane.xlu1 %1368 }
 0x264   : > { %1863 = vrcp.f32 %v1369_v37 }
 0x26a   : > { %v1864_v20 = vpop.eup %1863 }
 0x26b   : > { %v1371_v55 = vmul.f32 %v1864_v20, %v1862_v11 }
 0x26d   : > { %1372 = vst [vmem:[%s189_s20] sm:$0x1] %v1371_v55 }
 0x26e   : > { %1892 = shalt.err (!%p1889_p3)
}
 0x26f   : > { %1722 = dma.vmem_to_hbm [thread:$0]  (%p1993_p5), %s1385_s22, 16, %s1387_s23, %s1374_s27  }
 0x270 PF: > { %p1728_p4 = scmp.ge.s32.totalorder %s1927_s18, 2  ;;  %s1398_s7 = sand.u32 1, %s1915_s15  }
 0x271   : > { %s1399_s8 = scalar_lea.sflag [#allocation4], %s1398_s7 }
 0x272   : > { %p1725_p7 = pnand %p1728_p4, %p1997_p6 }
 0x274   : > { %p1726_p8 = pneg %p1725_p7 }
 0x276   : > { %1910 = dma.done.wait (%p1726_p8), %s1399_s8, 16  }
 0x277   : > { %1912 = vsyncadd (%p1726_p8), %s1399_s8, 4294967280  ;;  %p14_p9 = scmp.ge.s32.totalorder %s1980_s21, 4   ;;  %s2789_s15 = smov %s1919_s16 }
 0x278   : > { %s2790_s16 = smov %s1923_s17  ;;  %s2791_s17 = smov %s1991_s24 }
 0x279   : > { %s2792_s18 = smov %s1980_s21  ;;  %16 = sbr.rel (!%p14_p9) target bundleno = 3 (0x3), region = 71 }
 0x27e   :  { %1404 = vsyncpa [#allocation4], 1 }
 0x27f   :  { %1406 = vsyncpa [#allocation4 + $0x1], 1 }

</bundles_post_ra>
